<compile_context>
chip_gen: v6e
topology: v6e:2x2x1
jax: 0.10.0
libtpu: 0.0.40
codegen_flags: <defaults>
</compile_context>

<pallas_src>
import functools

import jax
import jax.numpy as jnp
from jax.experimental import pallas as pl
from jax.experimental.pallas import tpu as pltpu


# ----------------------------------------------------------------------------- kernel


def _causal_conv1d_kernel(x_ref, w_ref, b_ref, o_ref, win_ref, *,
                          tile_l, kernel_size, dilation, pad, align):
    # x_ref  : (1, C_in, TL)        input tile, NATIVE dtype (cast in-kernel)
    # w_ref  : (K, TCo, C_in)       compute dtype
    # b_ref  : (TCo, 1)             float32
    # o_ref  : (1, TCo, TL)         output dtype
    # win_ref: (C_in, ALIGN + TL)   compute dtype, persistent VMEM scratch
    #          cols [ALIGN-pad, ALIGN)     = causal left context (carry)
    #          cols [ALIGN, ALIGN+TL)      = current input tile (128-aligned)
    i = pl.program_id(2)  # L-tile index (innermost, sequential)

    if pad > 0:
        # Refresh the causal context BEFORE overwriting the tile region.
        @pl.when(i == 0)
        def _():
            # First L-tile of every (batch, C_out-tile): causal padding == 0.
            win_ref[:, align - pad:align] = jnp.zeros(
                (win_ref.shape[0], pad), win_ref.dtype)

        @pl.when(i != 0)
        def _():
            # Last `pad` input columns ending at the previous tile. Read into
            # vregs first, then store: correct even if pad >= tile_l (the
            # src/dst ranges overlap in that case).
            carry = win_ref[:, align + tile_l - pad:align + tile_l]
            win_ref[:, align - pad:align] = carry

    # In-kernel dtype cast (VPU work hidden under DMA/MXU); aligned full-tile
    # store because `align` is a multiple of 128.
    win_ref[:, align:] = x_ref[0].astype(win_ref.dtype)

    # One MXU matmul per kernel tap, accumulated in f32.
    base = align - pad
    acc = jnp.dot(w_ref[0], win_ref[:, base:base + tile_l],
                  preferred_element_type=jnp.float32)            # (TCo, TL)
    for k in range(1, kernel_size):
        s = base + k * dilation
        acc = acc + jnp.dot(w_ref[k], win_ref[:, s:s + tile_l],
                            preferred_element_type=jnp.float32)

    o_ref[0] = (acc + b_ref[...]).astype(o_ref.dtype)   # (TCo,1) bcasts over lanes


# ----------------------------------------------------------------------------- sizing


def _vmem_capacity_bytes():
    """Physical VMEM of the current TPU generation (fallback: 64 MiB, v7x-safe)."""
    try:
        return int(pltpu.get_tpu_info().vmem_capacity_bytes)
    except Exception:  # no TPU info available at trace time
        return 64 * 1024 * 1024


def _vmem_footprint(tile_l, tile_co, c_in, k, align, x_bytes, out_bytes, cd_bytes):
    """All VMEM residents for one grid step (double-buffered blocks included)."""
    x_blk = 2 * c_in * tile_l * x_bytes            # pipelined input tile
    o_blk = 2 * tile_co * tile_l * out_bytes       # pipelined output tile
    win = c_in * (align + tile_l) * cd_bytes       # persistent window scratch
    w_blk = 2 * k * tile_co * c_in * cd_bytes      # resident weights (conservative)
    acc = tile_co * tile_l * 4                     # f32 accumulator (vregs / spill)
    bias = 2 * tile_co * 4
    return x_blk + o_blk + win + w_blk + acc + bias


def _pick_co_tile(c_out, batch):
    """C_out tile: bounds the f32 accumulator / out block; when B < 2 it also
    exposes a second parallel grid axis for v7x's two TensorCores."""
    if c_out <= 256 and batch >= 2:
        return c_out
    for t in (256, 128, 64, 32, 16, 8):
        if c_out % t == 0 and t < c_out:
            return t
    return c_out


def _pick_tile_l(l_pad, footprint_fn, budget):
    """Largest 128-multiple L-tile dividing l_pad whose full VMEM footprint
    fits the generation-aware budget."""
    cands = sorted({t for t in (128, 256, 512, 1024, 2048, 4096)
                    if l_pad % t == 0} | {l_pad}, reverse=True)
    for t in cands:
        if footprint_fn(t) <= budget:
            return t
    return cands[-1]  # smallest candidate; vmem_limit_bytes is raised to cover it


# ----------------------------------------------------------------------------- wrapper


def causal_conv1d(x, weight, bias=None, *, dilation=1, compute_dtype=None,
                  out_dtype=None, tile_l=None, tile_co=None):
    """x: (B, C_in, L); weight: (C_out, C_in, K); bias: (C_out,) or None.
    Returns (B, C_out, L) -- matches CausalConv1d.forward (stride=1, groups=1).

    compute_dtype defaults to x.dtype (PyTorch-matching numerics); pass
    jnp.bfloat16 for MXU-native compute. out_dtype defaults to x.dtype.
    """
    B, C_in, L = x.shape
    C_out, C_in_w, K = weight.shape
    assert C_in_w == C_in, "groups != 1 not supported"
    pad = (K - 1) * dilation

    compute_dtype = x.dtype if compute_dtype is None else jnp.dtype(compute_dtype)
    out_dtype = x.dtype if out_dtype is None else jnp.dtype(out_dtype)

    # Right-pad L to a 128-multiple: keeps every tile lane-dense. Right padding
    # never influences causal outputs at positions < L; the tail is sliced off.
    L_pad = -(-L // 128) * 128
    x_in = x if L_pad == L else jnp.pad(x, ((0, 0), (0, 0), (0, L_pad - L)))

    # 128-aligned origin of the tile region inside the window scratch.
    align = 0 if pad == 0 else -(-pad // 128) * 128

    x_bytes = jnp.dtype(x.dtype).itemsize
    o_bytes = jnp.dtype(out_dtype).itemsize
    cd_bytes = jnp.dtype(compute_dtype).itemsize

    # Generation-aware VMEM budget (about half of physical: ~32 MiB on v7x,
    # ~64 MiB on v5e/v6e) -> biggest tiles that fit, fewer grid-step overheads.
    vmem_cap = _vmem_capacity_bytes()
    budget = vmem_cap // 2

    if tile_co is None:
        tile_co = _pick_co_tile(C_out, B)
    assert C_out % tile_co == 0 and (tile_co % 8 == 0 or tile_co == C_out)

    footprint_fn = lambda t: _vmem_footprint(
        t, tile_co, C_in, K, align, x_bytes, o_bytes, cd_bytes)
    if tile_l is None:
        tile_l = _pick_tile_l(L_pad, footprint_fn, budget)
    assert L_pad % tile_l == 0, "tile_l must divide the (padded) sequence length"
    n_l = L_pad // tile_l
    n_co = C_out // tile_co

    footprint = footprint_fn(tile_l)
    vmem_limit = int(min(max(3 * vmem_cap // 4, footprint + (2 << 20)),
                         vmem_cap - (4 << 20), 127 * 2 ** 20))

    # Glue (cheap): weight relayout/cast + bias column. x is NOT cast here.
    w_k = jnp.transpose(weight, (2, 0, 1)).astype(compute_dtype)   # (K, C_out, C_in)
    if bias is None:
        bias = jnp.zeros((C_out,), jnp.float32)
    b_col = bias.astype(jnp.float32).reshape(C_out, 1)             # (C_out, 1)

    kernel = functools.partial(_causal_conv1d_kernel, tile_l=tile_l,
                               kernel_size=K, dilation=dilation,
                               pad=pad, align=align)

    cost = pl.CostEstimate(
        flops=2 * B * L_pad * K * C_in * C_out,
        transcendentals=0,
        bytes_accessed=int(n_co * B * C_in * L_pad * x_bytes   # x re-read per C_out tile
                           + w_k.size * cd_bytes + C_out * 4
                           + B * C_out * L_pad * o_bytes),
    )

    out = pl.pallas_call(
        kernel,
        out_shape=jax.ShapeDtypeStruct((B, C_out, L_pad), out_dtype),
        grid_spec=pltpu.PrefetchScalarGridSpec(
            num_scalar_prefetch=0,
            grid=(B, n_co, n_l),
            in_specs=[
                pl.BlockSpec((1, C_in, tile_l), lambda b, co, i: (b, 0, i)),
                pl.BlockSpec((K, tile_co, C_in), lambda b, co, i: (0, co, 0)),
                pl.BlockSpec((tile_co, 1), lambda b, co, i: (co, 0)),
            ],
            out_specs=pl.BlockSpec((1, tile_co, tile_l),
                                   lambda b, co, i: (b, co, i)),
            scratch_shapes=[pltpu.VMEM((C_in, align + tile_l), compute_dtype)],
        ),
        compiler_params=pltpu.CompilerParams(
            # B and C_out tiles are independent -> megacore-parallel (v7x gets
            # both cores busy even when B == 1). The L-tile axis is innermost
            # and sequential because the causal carry (window scratch) flows
            # along it; the i==0 reset restarts the carry for every (b, co).
            dimension_semantics=("parallel", "parallel", "arbitrary"),
            vmem_limit_bytes=vmem_limit),
        cost_estimate=cost,
    )(x_in, w_k, b_col)

    return out if L_pad == L else out[:, :, :L]


# ----------------------------------------------------------------------------- reference & tests


def _reference(x, weight, bias, *, dilation=1):
    # Pure-JAX reference: left-padded (causal) conv1d in f32.
    K = weight.shape[-1]
    pad = (K - 1) * dilation
    out = jax.lax.conv_general_dilated(
        x, weight,
        window_strides=(1,),
        padding=[(pad, 0)],
        rhs_dilation=(dilation,),
        dimension_numbers=("NCH", "OIH", "NCH"),
    )
    return out + bias[None, :, None]


if __name__ == "__main__":
    # --- Test 1: module-doc shapes, default (f32) compute, padded tiny L ----
    B, C_in, C_out, L, K, dil = 2, 4, 8, 16, 3, 1
    kx, kw, kb = jax.random.split(jax.random.PRNGKey(0), 3)
    x = jax.random.normal(kx, (B, C_in, L), dtype=jnp.float32)
    # Conv1d weight shape: (out_channels, in_channels // groups, kernel_size)
    w = jax.random.normal(kw, (C_out, C_in, K), dtype=jnp.float32) * 0.1
    b = jax.random.normal(kb, (C_out,), dtype=jnp.float32) * 0.1

    out = jax.block_until_ready(causal_conv1d(x, w, b, dilation=dil))
    ref = _reference(x, w, b, dilation=dil)
    assert out.shape == (B, C_out, L)
    assert jnp.allclose(out, ref, atol=1e-3, rtol=1e-3)

    # --- Test 2: carry across L tiles, dilation=2, bf16 compute knob --------
    B2, C_in2, C_out2, L2, K2, dil2 = 2, 4, 8, 256, 3, 2
    kx2, kw2, kb2 = jax.random.split(jax.random.PRNGKey(1), 3)
    x2 = jax.random.normal(kx2, (B2, C_in2, L2), dtype=jnp.float32)
    w2 = jax.random.normal(kw2, (C_out2, C_in2, K2), dtype=jnp.float32) * 0.1
    b2 = jax.random.normal(kb2, (C_out2,), dtype=jnp.float32) * 0.1

    out2 = jax.block_until_ready(
        causal_conv1d(x2, w2, b2, dilation=dil2, tile_l=128,
                      compute_dtype=jnp.bfloat16))
    ref2 = _reference(x2, w2, b2, dilation=dil2)
    assert out2.shape == (B2, C_out2, L2)
    assert jnp.allclose(out2, ref2, atol=3e-2, rtol=3e-2)

    # --- Test 3: B=1 -> parallel C_out tiles + multi L-tile carry, f32 ------
    B3, C_in3, C_out3, L3, K3, dil3 = 1, 8, 64, 384, 4, 2
    kx3, kw3, kb3 = jax.random.split(jax.random.PRNGKey(2), 3)
    x3 = jax.random.normal(kx3, (B3, C_in3, L3), dtype=jnp.float32)
    w3 = jax.random.normal(kw3, (C_out3, C_in3, K3), dtype=jnp.float32) * 0.1
    b3 = jax.random.normal(kb3, (C_out3,), dtype=jnp.float32) * 0.1

    out3 = jax.block_until_ready(
        causal_conv1d(x3, w3, b3, dilation=dil3, tile_l=128))
    ref3 = _reference(x3, w3, b3, dilation=dil3)
    assert out3.shape == (B3, C_out3, L3)
    assert jnp.allclose(out3, ref3, atol=1e-3, rtol=1e-3)

    print("KERNEL_OK")
</pallas_src>

<mosaic_0001>
module attributes {stable_mosaic.version = 11 : i64} {
  func.func @_causal_conv1d_kernel(%arg0: i32, %arg1: i32, %arg2: i32, %arg3: memref<1x4x128xf32, #tpu.memory_space<vmem>>, %arg4: memref<3x8x4xf32, #tpu.memory_space<vmem>>, %arg5: memref<8x1xf32, #tpu.memory_space<vmem>>, %arg6: memref<1x8x128xf32, #tpu.memory_space<vmem>>, %arg7: memref<4x256xf32, #tpu.memory_space<vmem>>) attributes {dimension_semantics = [#tpu.dimension_semantics<parallel>, #tpu.dimension_semantics<parallel>, #tpu.dimension_semantics<arbitrary>], iteration_bounds = array<i64: 2, 1, 1>, scalar_prefetch = 0 : i64, scratch_operands = 1 : i64, tpu.core_type = #tpu.core_type<tc>, window_params = [{transform_indices = @transform_0, window_bounds = array<i64: 1, 4, 128>}, {transform_indices = @transform_1, window_bounds = array<i64: 3, 8, 4>}, {transform_indices = @transform_2, window_bounds = array<i64: 8, 1>}, {transform_indices = @transform_3, window_bounds = array<i64: 1, 8, 128>}]} {
    %c0_i32 = arith.constant 0 : i32
    %0 = arith.cmpi eq, %arg2, %c0_i32 : i32
    %1 = arith.extui %0 : i1 to i32
    %c0_i32_0 = arith.constant 0 : i32
    %2 = arith.cmpi ne, %1, %c0_i32_0 : i32
    scf.if %2 {
      %cst_24 = arith.constant 0.000000e+00 : f32
      %29 = vector.broadcast %cst_24 : f32 to vector<4x2xf32>
      %c0_25 = arith.constant 0 : index
      %c126_26 = arith.constant 126 : index
      %30 = vector.load %arg7[%c0_25, %c126_26] : memref<4x256xf32, #tpu.memory_space<vmem>>, vector<4x2xf32>
      tpu.vector_store %arg7[%c0_25, %c126_26], %29 {strides = array<i32>} : memref<4x256xf32, #tpu.memory_space<vmem>>, vector<4x2xf32>,
    } else {
    }
    %c0_i32_1 = arith.constant 0 : i32
    %3 = arith.cmpi ne, %arg2, %c0_i32_1 : i32
    %4 = arith.extui %3 : i1 to i32
    %c0_i32_2 = arith.constant 0 : i32
    %5 = arith.cmpi ne, %4, %c0_i32_2 : i32
    scf.if %5 {
      %c0_24 = arith.constant 0 : index
      %c254 = arith.constant 254 : index
      %29 = vector.load %arg7[%c0_24, %c254] : memref<4x256xf32, #tpu.memory_space<vmem>>, vector<4x2xf32>
      %c0_25 = arith.constant 0 : index
      %c126_26 = arith.constant 126 : index
      %30 = vector.load %arg7[%c0_25, %c126_26] : memref<4x256xf32, #tpu.memory_space<vmem>>, vector<4x2xf32>
      tpu.vector_store %arg7[%c0_25, %c126_26], %29 {strides = array<i32>} : memref<4x256xf32, #tpu.memory_space<vmem>>, vector<4x2xf32>,
    } else {
    }
    %c0 = arith.constant 0 : index
    %c0_3 = arith.constant 0 : index
    %c0_4 = arith.constant 0 : index
    %6 = vector.load %arg3[%c0, %c0_3, %c0_4] : memref<1x4x128xf32, #tpu.memory_space<vmem>>, vector<1x4x128xf32>
    %7 = vector.shape_cast %6 : vector<1x4x128xf32> to vector<4x128xf32>
    %c0_5 = arith.constant 0 : index
    %c128 = arith.constant 128 : index
    %8 = vector.load %arg7[%c0_5, %c128] : memref<4x256xf32, #tpu.memory_space<vmem>>, vector<4x128xf32>
    tpu.vector_store %arg7[%c0_5, %c128], %7 {strides = array<i32>} : memref<4x256xf32, #tpu.memory_space<vmem>>, vector<4x128xf32>,
    %c0_6 = arith.constant 0 : index
    %c0_7 = arith.constant 0 : index
    %c0_8 = arith.constant 0 : index
    %9 = vector.load %arg4[%c0_6, %c0_7, %c0_8] : memref<3x8x4xf32, #tpu.memory_space<vmem>>, vector<1x8x4xf32>
    %10 = vector.shape_cast %9 : vector<1x8x4xf32> to vector<8x4xf32>
    %c0_9 = arith.constant 0 : index
    %c126 = arith.constant 126 : index
    %11 = vector.load %arg7[%c0_9, %c126] : memref<4x256xf32, #tpu.memory_space<vmem>>, vector<4x128xf32>
    %cst = arith.constant dense<0.000000e+00> : vector<8x128xf32>
    %12 = tpu.matmul %10, %11, %cst {dimension_numbers = #tpu.dot_dimension_numbers<[1], [0], [0], [1], [0, 0, 1, 1], [], []>} : vector<8x4xf32>, vector<4x128xf32>, vector<8x128xf32> -> vector<8x128xf32>
    %c1 = arith.constant 1 : index
    %c0_10 = arith.constant 0 : index
    %c0_11 = arith.constant 0 : index
    %13 = vector.load %arg4[%c1, %c0_10, %c0_11] : memref<3x8x4xf32, #tpu.memory_space<vmem>>, vector<1x8x4xf32>
    %14 = vector.shape_cast %13 : vector<1x8x4xf32> to vector<8x4xf32>
    %c0_12 = arith.constant 0 : index
    %c127 = arith.constant 127 : index
    %15 = vector.load %arg7[%c0_12, %c127] : memref<4x256xf32, #tpu.memory_space<vmem>>, vector<4x128xf32>
    %cst_13 = arith.constant dense<0.000000e+00> : vector<8x128xf32>
    %16 = tpu.matmul %14, %15, %cst_13 {dimension_numbers = #tpu.dot_dimension_numbers<[1], [0], [0], [1], [0, 0, 1, 1], [], []>} : vector<8x4xf32>, vector<4x128xf32>, vector<8x128xf32> -> vector<8x128xf32>
    %17 = arith.addf %12, %16 : vector<8x128xf32>
    %c2 = arith.constant 2 : index
    %c0_14 = arith.constant 0 : index
    %c0_15 = arith.constant 0 : index
    %18 = vector.load %arg4[%c2, %c0_14, %c0_15] : memref<3x8x4xf32, #tpu.memory_space<vmem>>, vector<1x8x4xf32>
    %19 = vector.shape_cast %18 : vector<1x8x4xf32> to vector<8x4xf32>
    %c0_16 = arith.constant 0 : index
    %c128_17 = arith.constant 128 : index
    %20 = vector.load %arg7[%c0_16, %c128_17] : memref<4x256xf32, #tpu.memory_space<vmem>>, vector<4x128xf32>
    %cst_18 = arith.constant dense<0.000000e+00> : vector<8x128xf32>
    %21 = tpu.matmul %19, %20, %cst_18 {dimension_numbers = #tpu.dot_dimension_numbers<[1], [0], [0], [1], [0, 0, 1, 1], [], []>} : vector<8x4xf32>, vector<4x128xf32>, vector<8x128xf32> -> vector<8x128xf32>
    %22 = arith.addf %17, %21 : vector<8x128xf32>
    %c0_19 = arith.constant 0 : index
    %c0_20 = arith.constant 0 : index
    %23 = vector.load %arg5[%c0_19, %c0_20] : memref<8x1xf32, #tpu.memory_space<vmem>>, vector<8x1xf32>
    %24 = vector.broadcast %23 : vector<8x1xf32> to vector<8x128xf32>
    %25 = arith.addf %22, %24 : vector<8x128xf32>
    %c0_21 = arith.constant 0 : index
    %c0_22 = arith.constant 0 : index
    %c0_23 = arith.constant 0 : index
    %26 = vector.load %arg6[%c0_21, %c0_22, %c0_23] : memref<1x8x128xf32, #tpu.memory_space<vmem>>, vector<1x8x128xf32>
    %27 = vector.shape_cast %26 : vector<1x8x128xf32> to vector<8x128xf32>
    %28 = vector.shape_cast %25 : vector<8x128xf32> to vector<1x8x128xf32>
    tpu.vector_store %arg6[%c0_21, %c0_22, %c0_23], %28 {strides = array<i32>} : memref<1x8x128xf32, #tpu.memory_space<vmem>>, vector<1x8x128xf32>,
    return
  }
  func.func @transform_0(%arg0: i32, %arg1: i32, %arg2: i32) -> (i32, i32, i32) {
    %c0_i32 = arith.constant 0 : i32
    %c0_i32_0 = arith.constant 0 : i32
    return %arg0, %c0_i32, %arg2 : i32, i32, i32
  }
  func.func @transform_1(%arg0: i32, %arg1: i32, %arg2: i32) -> (i32, i32, i32) {
    %c0_i32 = arith.constant 0 : i32
    %c0_i32_0 = arith.constant 0 : i32
    %c0_i32_1 = arith.constant 0 : i32
    return %c0_i32, %arg1, %c0_i32_0 : i32, i32, i32
  }
  func.func @transform_2(%arg0: i32, %arg1: i32, %arg2: i32) -> (i32, i32) {
    %c0_i32 = arith.constant 0 : i32
    %c0_i32_0 = arith.constant 0 : i32
    return %arg1, %c0_i32 : i32, i32
  }
  func.func @transform_3(%arg0: i32, %arg1: i32, %arg2: i32) -> (i32, i32, i32) {
    %c0_i32 = arith.constant 0 : i32
    return %arg0, %arg1, %arg2 : i32, i32, i32
  }
}

</mosaic_0001>

<bundles_post_ra>
// kernel: tpu_custom_call.1
= control target key start
LH: loop header
LB: loop body
LE: loop exit
PB: predicated region body
PF: predicated region fallthrough
CT: control target
= control target key end

     0   :  { %8 = vsyncpa [#allocation4], 0  ;;  %s950_s0 = inlined_call_operand.vmem [shape: f32[2,4,128], index: 0, kind: input, shape index: {}]   ;;  %s951_s1 = inlined_call_operand.vmem [shape: f32[3,8,4], index: 1, kind: input, shape index: {}]   ;;  %s952_s2 = inlined_call_operand.vmem [shape: f32[8,1], index: 2, kind: input, shape index: {}]   ;;  %s953_s3 = inlined_call_operand.hbm [shape: f32[2,8,128], index: 3, kind: output, shape index: {}]  }
   0x1   :  { %10 = vsyncpa [#allocation4 + $0x1], 0  ;;  %s836_s12 = smov 0   ;;  %s838_s13 = smov 0  }
   0x2   :  { %s840_s14 = smov 0   ;;  %s842_s15 = smov 0  }
   0x3   :  { %s844_s16 = smov 0   ;;  %s846_s17 = smov 0  }
   0x4 LB: > { %s628_s18 = sadd.s32 4294967295, %s808_s17   ;;  %s629_s19 = sadd.s32 4294967294, %s808_s17   ;;  %s808_s17 = sphi %s846_s17, %s16_s17   ;;  %s804_s16 = sphi %s844_s16, %s960_s16   ;;  %s800_s15 = sphi %s842_s15, %s959_s15   ;;  %s796_s14 = sphi %s840_s14, %s958_s14   ;;  %s792_s13 = sphi %s838_s13, %s957_s13   ;;  %s788_s12 = sphi %s836_s12, %s956_s12  }
   0x5   : > { %s35_s20 = sadd.s32 1, %s804_s16  ;;  %s126_s21 = sadd.s32 1, %s796_s14 }
   0x6   : > { %p37_p0 = scmp.ge.s32.totalorder %s35_s20, 2  ;;  %p136_p1 = scmp.ne.s32.totalorder %s796_s14, %s792_s13 }
   0x7   : > { %p137_p2 = scmp.eq.s32.totalorder %s628_s18, 1  ;;  %p142_p3 = scmp.ne.s32.totalorder %s792_s13, %s788_s12 }
   0x8   : > { %s962_s20 = smov (%p37_p0, %s35_s20), 0  ;;  %p143_p5 = scmp.eq.s32.totalorder %s629_s19, 1 }
   0x9   : > { %p876_p4 = por %p137_p2, %p136_p1  ;;  %s119_s23 = ssub.s32 %s804_s16, %s962_s20 }
   0xa   : > { %p634_p6 = scmp.ge.s32.totalorder %s808_s17, 1  ;;  %p124_p7 = scmp.eq.s32.totalorder %s119_s23, 0 }
   0xb   : > { %p883_p8 = por %p143_p5, %p142_p3  ;;  %p185_p9 = scmp.lt.s32.totalorder %s808_s17, 3 }
   0xc   : > { %s889_s25 = scalar_select %p124_p7, %s796_s14, %s126_s21  }
   0xd   : > { %p186_p10 = pnand %p634_p6, %p185_p9 }
   0xe   : > { %p219_p11 = scmp.lt.s32.totalorder (!%p186_p10), %s800_s15, 1  ;;  %s813_s4 = smov (!%p186_p10), 2  }
   0xf   : > { %189 = sbr.rel (%p186_p10) target bundleno = 368 (0x170), region = 32  ;;  %s814_s5 = smov (!%p186_p10), 1  }
  0x10   : > { %s216_s21 = sand.u32 (!%p186_p10), 1, %s792_s13   ;;  %s815_s7 = smov (!%p186_p10), [#allocation3]  }
  0x11   : > { %s635_s23 = sshll.u32 (!%p186_p10), %s216_s21, 3  ;;  %s736_s8 = sshll.u32 (!%p186_p10), %s815_s7, 4  ;;  %s737_s8 = int_to_ptr.vmem [resolvable:$false] %s736_s8 }
  0x14   : > { %vm238_vm0 = vcmask 1044464   ;;  %v810_v0 = vmov 0.0   ;;  %s220_s26 = scalar_select %p219_p11, %s800_s15, 1  ;;  %vm811_vm1 = vmmov 0   ;;  %v812_v2 = vmov 0   ;;  %v499_v5 = vld [vmem:[%s952_s2] sm:$0xff] }
  0x15   : > { %239 = vst.msk [vmem:[#allocation2] sm:$0xf] %vm238_vm0, %v810_v0  ;;  %655 = vmatprep.subr.mxu0 %v810_v0  ;;  %660 = vmatprep.subr.mxu1 %v810_v0  ;;  %vm259_vm2 = vcmask 7168   ;;  %vm342_vm3 = vcmask 15360   ;;  %vm265_vm4 = vcmask 1043456   ;;  %v637_v10 = vld [vmem:[%s951_s1 + $0x8] sm:$0xff] }
  0x16   : > { %s636_s27 = sshll.u32 %s220_s26, 2  ;;  %657 = vmatprep.mubr.msk.f32.mxu0 %vm811_vm1, %v810_v0  ;;  %662 = vmatprep.mubr.msk.f32.mxu1 %vm811_vm1, %v810_v0  ;;  %vm261_vm5 = vcmask 31744   ;;  %v249_v13 = vld [vmem:[%s951_s1] sm:$0xff]  ;;  %v642_v15 = vld [vmem:[%s951_s1 + $0x10] sm:$0xff]  ;;  %s646_s26 = sshll.u32 %s800_s15, 7 }
  0x17   : > { %s225_s30 = scalar_lea.vmem %s950_s0, %s636_s27  ;;  %730 = vset.pattern.permute.xlu0 %v812_v2  ;;  %s218_s27 = scalar_lea.vmem [#allocation3], %s635_s23 }
  0x18   : > { %v247_v1 = vld [vmem:[%s225_s30] sm:$0xf]  ;;  %s523_s28 = sshll.u32 %s218_s27, 4  ;;  %s738_s15 = scalar_lea.vmem %s737_s8, 256  ;;  %s524_s28 = int_to_ptr.vmem [resolvable:$true] %s523_s28 }
  0x19   : > { %248 = vst [vmem:[#allocation2 + $0x4] sm:$0xf] %v247_v1  ;;  %s732_s6 = scalar_lea.vmem %s524_s28, 128  ;;  %p739_p1 = scmp.lt.s32.totalorder %s524_s28, %s737_s8 }
  0x1a   : > { %p733_p12 = scmp.ne.s32.totalorder %s524_s28, %s732_s6  ;;  %p740_p2 = scmp.lt.s32.totalorder %s738_s15, %s732_s6 }
  0x1c   : > { %p734_p13 = pnand %p733_p12, %p876_p4  ;;  %p741_p3 = por %p740_p2, %p739_p1 }
  0x1e   : > { %p735_p0 = pneg %p734_p13 }
  0x20   : > { %v250_v3 = vld [vmem:[#allocation2] sm:$0xff]  ;;  %p742_p5 = pnand %p741_p3, %p735_p0 }
  0x21   : > { %338 = vrot.lane.b32.xlu1 %v250_v3, %s813_s4  ;;  %255 = vrot.lane.b32.xlu0 %v250_v3, %s814_s5  ;;  %v254_v4 = vcombine.high %v250_v3, %v250_v3  ;;  %v421_v14 = vld [vmem:[#allocation2 + $0x4] sm:$0xf] }
  0x25   : > { %340 = vrot.lane.b32.xlu1 %v254_v4, %s813_s4  ;;  %257 = vrot.lane.b32.xlu0 %v254_v4, %s814_s5  ;;  %s521_s4 = scalar_lea.hbm %s953_s3, %s646_s26  ;;  %s508_s5 = scalar_lea.sflag [#allocation4], %s216_s21 }
  0x29   : > { %502 = vperm.xlu0 %730, %v499_v5  }
  0x93   : > { %v339_v6 = vpop.permute.xlu1 %338  ;;  %v256_v7 = vpop.permute.xlu0 %255 }
  0x97   : > { %v341_v8 = vpop.permute.xlu1 %340  ;;  %v258_v9 = vpop.permute.xlu0 %257 }
  0x98   : > { %v260_v11 = vsel %vm259_vm2, %v256_v7, %v258_v9  ;;  %v343_v12 = vsel %vm342_vm3, %v339_v6, %v341_v8 }
  0x99   : > { %656 = vmatpush3.msk.msra.mxu0 %vm265_vm4, %v260_v11  ;;  %661 = vmatpush3.msk.msra.mxu1 %vm265_vm4, %v343_v12 }
  0x9a   : > { %658 = vmatmul.mubr.msk.f32.vlgmr.msra.gmra.mxu0 %vm261_vm5, %v637_v10  ;;  %665 = vmatprep.subr.mxu0 %v810_v0 }
  0x9b   : > { %663 = vmatmul.mubr.msk.f32.vlgmr.msra.gmra.mxu1 %vm261_vm5, %v249_v13  ;;  %666 = vmatpush3.msk.msra.mxu0 %vm265_vm4, %v421_v14 }
  0x9c   : > { %667 = vmatprep.mubr.msk.f32.mxu0 %vm811_vm1, %v810_v0 }
  0x9e   : > { %668 = vmatmul.mubr.msk.f32.vlgmr.msra.gmra.mxu0 %vm261_vm5, %v642_v15 }
  0xa4   : > { %v503_v22 = vpop.permute.xlu0 %502 }
 0x15a   : > { %v334_v16 = vpop.f32.mrf.mxu0 }
 0x15b   : > { %v415_v17 = vpop.f32.mrf.mxu1 }
 0x15c   : > { %v659_v18 = vpop.f32.mrf.mxu0  ;;  %v416_v19 = vadd.f32 %v415_v17, %v334_v16 }
 0x15d   : > { %v664_v20 = vpop.f32.mrf.mxu1 }
 0x15e   : > { %v494_v21 = vpop.f32.mrf.mxu0 }
 0x15f   : > { %v498_v23 = vadd.f32 %v494_v21, %v416_v19 }
 0x160   : > { %v669_v24 = vpop.f32.mrf.mxu0 }
 0x161   : > { %v505_v25 = vadd.f32 %v503_v22, %v498_v23 }
 0x163   : > { %506 = vst [vmem:[%s218_s27] sm:$0xff] %v505_v25 }
 0x164   : > { %745 = shalt.err (!%p742_p5)
}
 0x165   : > { %s746_s9 = scalar_lea.hbm %s521_s4, 128  ;;  %s750_s18 = scalar_lea.hbm %s953_s3, 256 }
 0x166   : > { %p747_p6 = scmp.ne.s32.totalorder %s521_s4, %s746_s9  ;;  %p751_p10 = scmp.lt.s32.totalorder %s521_s4, %s953_s3 }
 0x167   : > { %p752_p11 = scmp.lt.s32.totalorder %s750_s18, %s746_s9 }
 0x168   : > { %p748_p7 = pnand %p747_p6, %p876_p4 }
 0x169   : > { %p753_p12 = por %p752_p11, %p751_p10 }
 0x16a   : > { %p749_p9 = pneg %p748_p7 }
 0x16c   : > { %p754_p13 = pnand %p753_p12, %p749_p9 }
 0x16e   : > { %757 = shalt.err (!%p754_p13)
}
 0x16f   : > { %670 = dma.vmem_to_hbm [thread:$0]  (%p876_p4), %s524_s28, 128, %s521_s4, %s508_s5  }
 0x170 PF: > { %p676_p0 = scmp.ge.s32.totalorder %s808_s17, 2  ;;  %s535_s23 = sand.u32 1, %s788_s12  }
 0x171   : > { %s536_s26 = scalar_lea.sflag [#allocation4], %s535_s23 }
 0x172   : > { %p673_p1 = pnand %p676_p0, %p883_p8 }
 0x174   : > { %p674_p2 = pneg %p673_p1 }
 0x176   : > { %783 = dma.done.wait (%p674_p2), %s536_s26, 128  }
 0x177   : > { %785 = vsyncadd (%p674_p2), %s536_s26, 4294967168  ;;  %s16_s17 = sadd.s32 1, %s808_s17   ;;  %s956_s12 = smov %s792_s13 }
 0x178   : > { %p13_p3 = scmp.ge.s32.totalorder %s16_s17, 4   ;;  %s957_s13 = smov %s796_s14 }
 0x179   : > { %s958_s14 = smov %s889_s25  ;;  %s959_s15 = smov %s804_s16 }
 0x17a   : > { %s960_s16 = smov %s962_s20  ;;  %15 = sbr.rel (!%p13_p3) target bundleno = 4 (0x4), region = 83 }
 0x17f   :  { %541 = vsyncpa [#allocation4], 1 }
 0x180   :  { %543 = vsyncpa [#allocation4 + $0x1], 1 }

</bundles_post_ra>
